<compile_context>
chip_gen: v7x
topology: tpu7x:2x2x1
jax: 0.10.0
libtpu: 0.0.40
codegen_flags: <defaults>
</compile_context>

<pallas_src>
import jax
import jax.numpy as jnp
from jax.experimental import pallas as pl
from jax.experimental.pallas import tpu as pltpu


def _round_up(x, m):
    return ((x + m - 1) // m) * m


def _wide_deep_kernel(wide_ref, w1a_ref, b1_ref, w2_ref, b2_ref, w3d_ref,
                      b3_ref, out_ref):
    """Fused MLP over one batch tile, batch-in-lanes (transposed) layout."""
    h1 = b1_ref.shape[0]                               # static
    wide = wide_ref[...]                               # (I, TB)  bf16

    # fc1 with fc3's wide-skip row folded in as the last output row:
    #   (H1+1, I) @ (I, TB) -> (H1+1, TB)   (bf16 MXU, f32 accumulation)
    z = jnp.dot(w1a_ref[...], wide, preferred_element_type=jnp.float32)
    wide_term = z[h1:, :]                              # (1, TB) = w3[:I]^T @ wide
    x = jnp.maximum(z[:h1, :] + b1_ref[...], 0.0)      # fc1 bias + ReLU (f32 VPU)
    # dropout = identity (eval semantics)

    # fc2 + ReLU:  (H, H1) @ (H1, TB) -> (H, TB)
    x = jnp.dot(w2_ref[...], x.astype(jnp.bfloat16),
                preferred_element_type=jnp.float32)
    x = jnp.maximum(x + b2_ref[...], 0.0)

    # fc3 deep term: (1, H) @ (H, TB)   (tiny MXU dot; MXU has slack)
    deep_term = jnp.dot(w3d_ref[...], x.astype(jnp.bfloat16),
                        preferred_element_type=jnp.float32)

    out_ref[...] = (wide_term + deep_term + b3_ref[0]).astype(out_ref.dtype)


def prepare_params(params):
    """One-time weight preprocessing (hoisted out of the per-call forward):
    transposed layout, fc3-wide row folded into W1, bf16 casts."""
    w1 = jnp.asarray(params["w1"], jnp.float32)        # (I, H1)
    w2 = jnp.asarray(params["w2"], jnp.float32)        # (H1, H)
    w3 = jnp.asarray(params["w3"], jnp.float32)        # (I + H, 1)
    I, H1 = w1.shape
    H = w2.shape[1]
    # W1^T with fc3's wide weights appended as one extra output row.
    w1a = jnp.concatenate([w1.T, w3[:I].T], axis=0).astype(jnp.bfloat16)
    return {
        "user_embedding": jnp.asarray(params["user_embedding"], jnp.float32),
        "item_embedding": jnp.asarray(params["item_embedding"], jnp.float32),
        "w1a": w1a,                                            # (H1+1, I) bf16
        "b1": jnp.asarray(params["b1"], jnp.float32).reshape(H1, 1),
        "w2t": w2.T.astype(jnp.bfloat16),                      # (H, H1)   bf16
        "b2": jnp.asarray(params["b2"], jnp.float32).reshape(H, 1),
        "w3d": w3[I:].T.astype(jnp.bfloat16),                  # (1, H)    bf16
        "b3": jnp.asarray(params["b3"], jnp.float32).reshape(-1),   # (1,) SMEM
    }


def wide_and_deep_forward(prepared, user, item, item_feature, *, block_b=2048):
    """Embedding gather + concat (JAX glue; tables are tiny) + Pallas MLP."""
    # TODO(synk): for very large embedding tables the gather could be fused
    # into the kernel via scalar-prefetched indices + manual DMA; skipped here.
    user_emb = jnp.take(prepared["user_embedding"], user, axis=0)   # (B, E)
    item_emb = jnp.take(prepared["item_embedding"], item, axis=0)   # (B, E)
    wide = jnp.concatenate(
        [user_emb, item_emb, item_feature.astype(jnp.float32)], axis=-1)

    B, I = wide.shape
    H1 = prepared["w1a"].shape[0] - 1
    H = prepared["w2t"].shape[0]

    # Batch tile: multiple of 128 lanes; >=2 tiles when possible so the
    # "parallel" batch axis can shard across both TensorCores on v7x.
    block_b = max(128, _round_up(block_b, 128))
    TB = min(block_b, max(128, _round_up(pl.cdiv(B, 2), 128)))
    B_pad = _round_up(B, TB)
    n_tiles = B_pad // TB

    # Batch-in-lanes activations: wide^T, padded, bf16 (halves DMA bytes).
    if B_pad != B:
        wide = jnp.pad(wide, ((0, B_pad - B), (0, 0)))
    wide_t = wide.T.astype(jnp.bfloat16)                            # (I, B_pad)

    resident = lambda shape: pl.BlockSpec(shape, lambda i: (0, 0))

    flops = 2 * B_pad * (I * (H1 + 1) + H1 * H + H)
    bytes_accessed = (B_pad * I * 2                     # bf16 activations in
                      + B_pad * 4                       # f32 output row
                      + ((H1 + 1) * I + H * H1 + H) * 2 # bf16 weights
                      + (H1 + H + 1) * 4)               # f32 biases

    out = pl.pallas_call(
        _wide_deep_kernel,
        out_shape=jax.ShapeDtypeStruct((1, B_pad), jnp.float32),
        grid_spec=pltpu.PrefetchScalarGridSpec(
            num_scalar_prefetch=0,
            grid=(n_tiles,),
            in_specs=[
                pl.BlockSpec((I, TB), lambda i: (0, i)),   # wide^T (pipelined)
                resident((H1 + 1, I)),                     # W1^T ++ w3 wide row
                resident((H1, 1)),                         # b1
                resident((H, H1)),                         # W2^T
                resident((H, 1)),                          # b2
                resident((1, H)),                          # w3 deep part
                pl.BlockSpec(memory_space=pltpu.MemorySpace.SMEM),   # b3 scalar
            ],
            out_specs=pl.BlockSpec((1, TB), lambda i: (0, i)),       # lane-dense
        ),
        compiler_params=pltpu.CompilerParams(
            dimension_semantics=("parallel",),       # megacore on v7x
            vmem_limit_bytes=32 * 1024 * 1024),      # safe on v5e/v6e/v7x
        cost_estimate=pl.CostEstimate(flops=flops, transcendentals=0,
                                      bytes_accessed=bytes_accessed),
    )(wide_t, prepared["w1a"], prepared["b1"], prepared["w2t"],
      prepared["b2"], prepared["w3d"], prepared["b3"])

    return out[0, :B].reshape(B, 1)


def init_params(key, num_users, num_items, embedding_dim, hidden_units,
                item_feature_size):
    """Deterministic synthetic parameter init (shapes match the nn.Module)."""
    input_size = 2 * embedding_dim + item_feature_size
    h1 = input_size // 2
    keys = jax.random.split(key, 8)

    def uni(k, shape, scale):
        return jax.random.uniform(k, shape, jnp.float32, -scale, scale)

    return {
        "user_embedding": jax.random.normal(keys[0], (num_users, embedding_dim),
                                            jnp.float32),
        "item_embedding": jax.random.normal(keys[1], (num_items, embedding_dim),
                                            jnp.float32),
        # Linear weights stored [in, out] (= PyTorch weight.T).
        "w1": uni(keys[2], (input_size, h1), 1.0 / jnp.sqrt(input_size)),
        "b1": uni(keys[3], (1, h1), 1.0 / jnp.sqrt(input_size)),
        "w2": uni(keys[4], (h1, hidden_units), 1.0 / jnp.sqrt(h1)),
        "b2": uni(keys[5], (1, hidden_units), 1.0 / jnp.sqrt(h1)),
        "w3": uni(keys[6], (hidden_units + input_size, 1),
                  1.0 / jnp.sqrt(hidden_units + input_size)),
        "b3": uni(keys[7], (1, 1), 1.0 / jnp.sqrt(hidden_units + input_size)),
    }


def reference_forward(params, user, item, item_feature):
    """Pure-JAX f32 reference of the PyTorch forward (dropout = identity)."""
    user_emb = jnp.take(params["user_embedding"], user, axis=0)
    item_emb = jnp.take(params["item_embedding"], item, axis=0)
    wide = jnp.concatenate([user_emb, item_emb,
                            item_feature.astype(jnp.float32)], axis=-1)
    x = jnp.maximum(wide @ params["w1"] + params["b1"], 0.0)
    x = jnp.maximum(x @ params["w2"] + params["b2"], 0.0)
    wd = jnp.concatenate([wide, x], axis=-1)
    return wd @ params["w3"] + params["b3"]


if __name__ == "__main__":
    num_users = 32
    num_items = 64
    embedding_dim = 16
    hidden_units = 32
    item_feature_size = 8
    batch = 8

    root = jax.random.PRNGKey(0)
    k_params, k_u, k_i, k_f = jax.random.split(root, 4)

    params = init_params(k_params, num_users, num_items, embedding_dim,
                         hidden_units, item_feature_size)
    prepared = prepare_params(params)          # one-time weight preprocessing

    user = jax.random.randint(k_u, (batch,), 0, num_users, dtype=jnp.int32)
    item = jax.random.randint(k_i, (batch,), 0, num_items, dtype=jnp.int32)
    item_feature = jax.random.normal(k_f, (batch, item_feature_size),
                                     jnp.float32)

    out = wide_and_deep_forward(prepared, user, item, item_feature)
    out = jax.block_until_ready(out)

    ref = reference_forward(params, user, item, item_feature)
    assert out.shape == (batch, 1), out.shape
    # bf16 matmul operands (f32 accumulation) -> loosened tolerance vs f32 ref.
    assert jnp.allclose(out, ref, atol=5e-2, rtol=5e-2), (out, ref)

    # TODO(synk): dropout is treated as identity (eval-mode semantics);
    # stochastic training dropout would use pltpu.prng_* if ever needed.
    print("KERNEL_OK")
</pallas_src>

<mosaic_0001>
module attributes {stable_mosaic.version = 11 : i64} {
  func.func @_wide_deep_kernel(%arg0: i32, %arg1: memref<40x128xbf16, #tpu.memory_space<vmem>>, %arg2: memref<21x40xbf16, #tpu.memory_space<vmem>>, %arg3: memref<20x1xf32, #tpu.memory_space<vmem>>, %arg4: memref<32x20xbf16, #tpu.memory_space<vmem>>, %arg5: memref<32x1xf32, #tpu.memory_space<vmem>>, %arg6: memref<1x32xbf16, #tpu.memory_space<vmem>>, %arg7: memref<1xf32, #tpu.memory_space<smem>>, %arg8: memref<1x128xf32, #tpu.memory_space<vmem>>) attributes {dimension_semantics = [#tpu.dimension_semantics<parallel>], iteration_bounds = array<i64: 1>, scalar_prefetch = 0 : i64, scratch_operands = 0 : i64, tpu.core_type = #tpu.core_type<tc>, window_params = [{transform_indices = @transform_0, window_bounds = array<i64: 40, 128>}, {pipeline_mode = #tpu.pipeline_mode<synchronous>, transform_indices = @transform_1, window_bounds = array<i64: 21, 40>}, {pipeline_mode = #tpu.pipeline_mode<synchronous>, transform_indices = @transform_2, window_bounds = array<i64: 20, 1>}, {pipeline_mode = #tpu.pipeline_mode<synchronous>, transform_indices = @transform_3, window_bounds = array<i64: 32, 20>}, {pipeline_mode = #tpu.pipeline_mode<synchronous>, transform_indices = @transform_4, window_bounds = array<i64: 32, 1>}, {pipeline_mode = #tpu.pipeline_mode<synchronous>, transform_indices = @transform_5, window_bounds = array<i64: 1, 32>}, {transform_indices = @transform_6, window_bounds = array<i64: 1>}, {transform_indices = @transform_7, window_bounds = array<i64: 1, 128>}]} {
    %c0 = arith.constant 0 : index
    %c0_0 = arith.constant 0 : index
    %0 = vector.load %arg1[%c0, %c0_0] : memref<40x128xbf16, #tpu.memory_space<vmem>>, vector<40x128xbf16>
    %c0_1 = arith.constant 0 : index
    %c0_2 = arith.constant 0 : index
    %1 = vector.load %arg2[%c0_1, %c0_2] : memref<21x40xbf16, #tpu.memory_space<vmem>>, vector<21x40xbf16>
    %cst = arith.constant dense<0.000000e+00> : vector<21x128xf32>
    %2 = tpu.matmul %1, %0, %cst {dimension_numbers = #tpu.dot_dimension_numbers<[1], [0], [0], [1], [0, 0, 1, 1], [], []>} : vector<21x40xbf16>, vector<40x128xbf16>, vector<21x128xf32> -> vector<21x128xf32>
    %3 = vector.extract_strided_slice %2 {offsets = [20, 0], sizes = [1, 128], strides = [1, 1]} : vector<21x128xf32> to vector<1x128xf32>
    %4 = vector.extract_strided_slice %2 {offsets = [0, 0], sizes = [20, 128], strides = [1, 1]} : vector<21x128xf32> to vector<20x128xf32>
    %c0_3 = arith.constant 0 : index
    %c0_4 = arith.constant 0 : index
    %5 = vector.load %arg3[%c0_3, %c0_4] : memref<20x1xf32, #tpu.memory_space<vmem>>, vector<20x1xf32>
    %6 = vector.broadcast %5 : vector<20x1xf32> to vector<20x128xf32>
    %7 = arith.addf %4, %6 : vector<20x128xf32>
    %cst_5 = arith.constant 0.000000e+00 : f32
    %8 = vector.broadcast %cst_5 : f32 to vector<20x128xf32>
    %9 = arith.maximumf %7, %8 : vector<20x128xf32>
    %c0_6 = arith.constant 0 : index
    %c0_7 = arith.constant 0 : index
    %10 = vector.load %arg4[%c0_6, %c0_7] : memref<32x20xbf16, #tpu.memory_space<vmem>>, vector<32x20xbf16>
    %11 = arith.truncf %9 : vector<20x128xf32> to vector<20x128xbf16>
    %cst_8 = arith.constant dense<0.000000e+00> : vector<32x128xf32>
    %12 = tpu.matmul %10, %11, %cst_8 {dimension_numbers = #tpu.dot_dimension_numbers<[1], [0], [0], [1], [0, 0, 1, 1], [], []>} : vector<32x20xbf16>, vector<20x128xbf16>, vector<32x128xf32> -> vector<32x128xf32>
    %c0_9 = arith.constant 0 : index
    %c0_10 = arith.constant 0 : index
    %13 = vector.load %arg5[%c0_9, %c0_10] : memref<32x1xf32, #tpu.memory_space<vmem>>, vector<32x1xf32>
    %14 = vector.broadcast %13 : vector<32x1xf32> to vector<32x128xf32>
    %15 = arith.addf %12, %14 : vector<32x128xf32>
    %cst_11 = arith.constant 0.000000e+00 : f32
    %16 = vector.broadcast %cst_11 : f32 to vector<32x128xf32>
    %17 = arith.maximumf %15, %16 : vector<32x128xf32>
    %c0_12 = arith.constant 0 : index
    %c0_13 = arith.constant 0 : index
    %18 = vector.load %arg6[%c0_12, %c0_13] : memref<1x32xbf16, #tpu.memory_space<vmem>>, vector<1x32xbf16>
    %19 = arith.truncf %17 : vector<32x128xf32> to vector<32x128xbf16>
    %cst_14 = arith.constant dense<0.000000e+00> : vector<1x128xf32>
    %20 = tpu.matmul %18, %19, %cst_14 {dimension_numbers = #tpu.dot_dimension_numbers<[1], [0], [0], [1], [0, 0, 1, 1], [], []>} : vector<1x32xbf16>, vector<32x128xbf16>, vector<1x128xf32> -> vector<1x128xf32>
    %21 = arith.addf %3, %20 : vector<1x128xf32>
    %c0_15 = arith.constant 0 : index
    %22 = memref.load %arg7[%c0_15] : memref<1xf32, #tpu.memory_space<smem>>
    %23 = vector.broadcast %22 : f32 to vector<1x128xf32>
    %24 = arith.addf %21, %23 : vector<1x128xf32>
    %c0_16 = arith.constant 0 : index
    %c0_17 = arith.constant 0 : index
    %25 = vector.load %arg8[%c0_16, %c0_17] : memref<1x128xf32, #tpu.memory_space<vmem>>, vector<1x128xf32>
    tpu.vector_store %arg8[%c0_16, %c0_17], %24 {strides = array<i32>} : memref<1x128xf32, #tpu.memory_space<vmem>>, vector<1x128xf32>,
    return
  }
  func.func @transform_0(%arg0: i32) -> (i32, i32) {
    %c0_i32 = arith.constant 0 : i32
    %c0_i32_0 = arith.constant 0 : i32
    return %c0_i32, %arg0 : i32, i32
  }
  func.func @transform_1(%arg0: i32) -> (i32, i32) {
    %c0_i32 = arith.constant 0 : i32
    %c0_i32_0 = arith.constant 0 : i32
    %c0_i32_1 = arith.constant 0 : i32
    return %c0_i32, %c0_i32_0 : i32, i32
  }
  func.func @transform_2(%arg0: i32) -> (i32, i32) {
    %c0_i32 = arith.constant 0 : i32
    %c0_i32_0 = arith.constant 0 : i32
    %c0_i32_1 = arith.constant 0 : i32
    return %c0_i32, %c0_i32_0 : i32, i32
  }
  func.func @transform_3(%arg0: i32) -> (i32, i32) {
    %c0_i32 = arith.constant 0 : i32
    %c0_i32_0 = arith.constant 0 : i32
    %c0_i32_1 = arith.constant 0 : i32
    return %c0_i32, %c0_i32_0 : i32, i32
  }
  func.func @transform_4(%arg0: i32) -> (i32, i32) {
    %c0_i32 = arith.constant 0 : i32
    %c0_i32_0 = arith.constant 0 : i32
    %c0_i32_1 = arith.constant 0 : i32
    return %c0_i32, %c0_i32_0 : i32, i32
  }
  func.func @transform_5(%arg0: i32) -> (i32, i32) {
    %c0_i32 = arith.constant 0 : i32
    %c0_i32_0 = arith.constant 0 : i32
    %c0_i32_1 = arith.constant 0 : i32
    return %c0_i32, %c0_i32_0 : i32, i32
  }
  func.func @transform_6(%arg0: i32) -> i32 {
    %c0_i32 = arith.constant 0 : i32
    %c0_i32_0 = arith.constant 0 : i32
    return %c0_i32 : i32
  }
  func.func @transform_7(%arg0: i32) -> (i32, i32) {
    %c0_i32 = arith.constant 0 : i32
    %c0_i32_0 = arith.constant 0 : i32
    return %c0_i32, %arg0 : i32, i32
  }
}

</mosaic_0001>

<bundles_post_ra>
// kernel: tpu_custom_call.1
= control target key start
LH: loop header
LB: loop body
LE: loop exit
PB: predicated region body
PF: predicated region fallthrough
CT: control target
= control target key end

     0   :  { %vm60_vm0 = vcmask 326656   ;;  %v405_v4 = vmov 0   ;;  %vm67_vm1 = vcmask 1043456   ;;  %s513_s0 = inlined_call_operand.vmem [shape: bf16[40,128], index: 0, kind: input, shape index: {}]   ;;  %s514_s1 = inlined_call_operand.vmem [shape: bf16[21,40], index: 1, kind: input, shape index: {}]   ;;  %s515_s2 = inlined_call_operand.vmem [shape: f32[20,1], index: 2, kind: input, shape index: {}]   ;;  %s516_s3 = inlined_call_operand.vmem [shape: bf16[32,20], index: 3, kind: input, shape index: {}]   ;;  %s517_s4 = inlined_call_operand.vmem [shape: f32[32,1], index: 4, kind: input, shape index: {}]   ;;  %s518_s5 = inlined_call_operand.vmem [shape: bf16[1,32], index: 5, kind: input, shape index: {}]   ;;  %s519_s6 = inlined_call_operand.<no memory space> [shape: f32[1], index: 6, kind: input, shape index: {}]   ;;  %s520_s7 = inlined_call_operand.hbm [shape: f32[1,128], index: 7, kind: output, shape index: {}]  }
   0x1   :  { %v374_v0 = vld [vmem:[%s513_s0] sm:$0xff]   ;;  %v375_v1 = vld [vmem:[%s513_s0 + $0x8] sm:$0xff]   ;;  %v376_v3 = vld [vmem:[%s513_s0 + $0x10] ss:$0 sps:$4 sm:$0xff]   ;;  %372 = vset.pattern.permute.xlu0 %v405_v4  ;;  %373 = vset.pattern.permute.xlu1 %v405_v4 }
   0x2   :  { %340 = vmatprep.subr.bf16.mxu0 %v374_v0  ;;  %v377_v2 = vld [vmem:[%s514_s1] sm:$0xff]   ;;  %v121_v6 = vld [vmem:[%s515_s2 + $0x10] sm:$0xf]  ;;  %v120_v7 = vld [vmem:[%s515_s2 + $0x8] sm:$0xff]  ;;  %v69_v8 = vsel %vm67_vm1, %v376_v3, 0 }
   0x3   :  { %341 = vmatpush3.bf16.msra.mxu0 %v374_v0  ;;  %v119_v5 = vld [vmem:[%s515_s2] sm:$0xff]  ;;  %346 = vmatprep.mubr.msk.bf16.mxu0 %vm60_vm0, %v377_v2 }
   0x4   :  { %342 = vmatprep.subr.bf16.mxu0 %v375_v1  ;;  %124 = vperm.xlu0 %372, %v119_v5   ;;  %v149_v9 = vld [vmem:[%s517_s4] sm:$0xff] }
   0x5   :  { %134 = vperm.xlu1 %373, %v121_v6  }
   0x7   :  { %343 = vmatpush3.bf16.msra.mxu0 %v375_v1 }
   0x8   :  { %366 = vmatprep.subr.msk.bf16.mxu0 %vm67_vm1, %v376_v3 }
   0x9   :  { %13 = vsyncpa [#allocation4], 0  ;;  %129 = vperm.xlu0 %372, %v120_v7   ;;  %v378_v10 = vld [vmem:[%s514_s1 + $0x8] ss:$0 sps:$4 sm:$0x77]   ;;  %155 = vperm.xlu1 %373, %v149_v9   ;;  %v151_v12 = vld [vmem:[%s517_s4 + $0x10] sm:$0xff]  ;;  %v299_v56 = vstv %s519_s6 }
   0xa   :  { %v150_v11 = vld [vmem:[%s517_s4 + $0x8] sm:$0xff]  ;;  %v152_v13 = vld [vmem:[%s517_s4 + $0x18] sm:$0xff]  ;;  %v379_v14 = vld [vmem:[%s516_s3] sm:$0xff]   ;;  %vm183_vm2 = vcmask 162816   ;;  %vm190_vm3 = vcmask 1041408   ;;  %v406_v32 = vmov 0.0  }
   0xb   :  { %345 = vmatpush3.bf16.msra.mxu0 %v69_v8  ;;  %354 = vmatprep.mubr.msk.bf16.mxu1 %vm183_vm2, %v379_v14  ;;  %v380_v31 = vld [vmem:[%s516_s3 + $0x8] sm:$0xff]   ;;  %vm407_vm4 = vmmov 0   ;;  %v247_v51 = vld [vmem:[%s518_s5] sm:$0x1]  ;;  %vm250_vm5 = vcmask 261120   ;;  %s408_s28 = smov [#allocation3]  }
   0xc   :  { %s308_s29 = sshll.u32 %s408_s28, 4  ;;  %s309_s29 = int_to_ptr.vmem [resolvable:$true] %s308_s29 }
   0xd   :  { %160 = vperm.xlu0 %372, %v150_v11   ;;  %165 = vperm.xlu1 %373, %v151_v12   ;;  %s381_s30 = scalar_lea.vmem %s309_s29, 16  ;;  %s385_s5 = scalar_lea.vmem %s309_s29, 32 }
   0xe   :  { %347 = vmatmul.mubr.msk.bf16.vlgmr.msra.gmra.mrb[0].mxu0 %vm60_vm0, %v378_v10  ;;  %p382_p0 = scmp.ne.s32.totalorder %s309_s29, %s381_s30  ;;  %p386_p1 = scmp.lt.s32.totalorder %s309_s29, %s309_s29 }
   0xf   :  { %p387_p2 = scmp.lt.s32.totalorder %s385_s5, %s381_s30 }
  0x11   :  { %170 = vperm.xlu0 %372, %v152_v13   ;;  %p388_p3 = por %p387_p2, %p386_p1 }
  0x13   :  { %p389_p4 = pnand %p388_p3, %p382_p0 }
  0x83   :  { %v125_v15 = vpop.permute.xlu0 %124 }
  0x84   :  { %v135_v16 = vpop.permute.xlu1 %134 }
  0x88   :  { %v130_v22 = vpop.permute.xlu0 %129  ;;  %v156_v33 = vpop.permute.xlu1 %155 }
  0x8c   :  { %v161_v34 = vpop.permute.xlu0 %160  ;;  %v166_v35 = vpop.permute.xlu1 %165 }
  0x90   :  { %v171_v39 = vpop.permute.xlu0 %170 }
  0xe1   :  { %v348_v17 = vpop.f32.mrb[0].mxu0 }
  0xe2   :  { %v105_v18 = vpop.f32.mrb[1].mxu0  ;;  %v139_v19 = vadd.f32 %v348_v17, %v135_v16 }
  0xe3   :  { %v137_v20 = vadd.f32 %v125_v15, %v105_v18  ;;  %v349_v21 = vpop.f32.mrb[2].mxu0 }
  0xe4   :  { %v108_v23 = vpop.f32.mrb[3].mxu0  ;;  %v142_v25 = vmax.f32 %v139_v19, 0.0 }
  0xe5   :  { %v138_v24 = vadd.f32 %v130_v22, %v108_v23  ;;  %v140_v26 = vmax.f32 %v137_v20, 0.0 }
  0xe6   :  { %v148_v29 = vpack.c.bf16 %v142_v25, %v142_v25 }
  0xe7   :  { %v141_v27 = vmax.f32 %v138_v24, 0.0 }
  0xe8   :  { %v192_v30 = vsel %vm190_vm3, %v148_v29, 0 }
  0xe9   :  { %v147_v28 = vpack.c.bf16 %v141_v27, %v140_v26 }
  0xeb   :  { %350 = vmatprep.subr.bf16.mxu1 %v147_v28 }
  0xec   :  { %351 = vmatpush3.bf16.msra.mxu1 %v147_v28 }
  0xed   :  { %367 = vmatprep.subr.msk.bf16.mxu1 %vm190_vm3, %v148_v29 }
  0xf0   :  { %353 = vmatpush3.bf16.msra.mxu1 %v192_v30 }
  0xf1   :  { %358 = vmatprep.subr.bf16.mxu1 %v406_v32 }
  0xf3   :  { %355 = vmatmul.mubr.msk.bf16.vlgmr.msra.gmra.mrb[0].mxu1 %vm183_vm2, %v380_v31 }
  0xf4   :  { %362 = vmatprep.mubr.msk.bf16.mxu1 %vm407_vm4, %v406_v32 }
 0x1c6   :  { %v356_v36 = vpop.f32.mrb[0].mxu1 }
 0x1c7   :  { %v237_v37 = vadd.f32 %v356_v36, %v166_v35  ;;  %v228_v38 = vpop.f32.mrb[1].mxu1 }
 0x1c8   :  { %v229_v40 = vadd.f32 %v228_v38, %v156_v33  ;;  %v357_v41 = vpop.f32.mrb[2].mxu1 }
 0x1c9   :  { %v240_v42 = vadd.f32 %v357_v41, %v171_v39  ;;  %v231_v43 = vpop.f32.mrb[3].mxu1  ;;  %v245_v45 = vmax.f32 %v237_v37, 0.0 }
 0x1ca   :  { %v232_v44 = vadd.f32 %v231_v43, %v161_v34  ;;  %v243_v47 = vmax.f32 %v229_v40, 0.0 }
 0x1cb   :  { %v246_v46 = vmax.f32 %v240_v42, 0.0 }
 0x1cc   :  { %v244_v48 = vmax.f32 %v232_v44, 0.0 }
 0x1cd   :  { %v249_v49 = vpack.c.bf16 %v246_v46, %v245_v45 }
 0x1ce   :  { %v248_v50 = vpack.c.bf16 %v244_v48, %v243_v47 }
 0x1d0   :  { %359 = vmatpush3.bf16.msra.mxu1 %v248_v50 }
 0x1d1   :  { %360 = vmatprep.subr.bf16.mxu1 %v406_v32 }
 0x1d4   :  { %361 = vmatpush3.bf16.msra.mxu1 %v249_v49 }
 0x1d7   :  { %363 = vmatmul.mubr.msk.bf16.vlgmr.msra.gmra.mrb[4].mxu1 %vm250_vm5, %v247_v51 }
 0x2aa   :  { %v288_v52 = vpop.f32.mrb[4].mxu1 }
 0x2ab   :  { %v295_v53 = vrot.slane %v288_v52, 4  ;;  %v364_v54 = vpop.f32.mrb[5].mxu1 }
 0x2ac   :  { %v291_v55 = vpop.f32.mrb[6].mxu1 }
 0x2ad   :  { %v297_v57 = vadd.f32 %v348_v17, %v295_v53  ;;  %v365_v58 = vpop.f32.mrb[7].mxu1 }
 0x2af   :  { %v300_v59 = vadd.f32 %v299_v56, %v297_v57 }
 0x2b1   :  { %301 = vst [vmem:[#allocation3 - $0x4] sm:$0x10] %v300_v59 }
 0x2b2   :  { %392 = shalt.err (!%p389_p4)
}
 0x2b3   :  { %s393_s10 = scalar_lea.hbm %s520_s7, 16 }
 0x2b4   :  { %p394_p5 = scmp.ne.s32.totalorder %s520_s7, %s393_s10  ;;  %p397_p6 = scmp.lt.u32.totalorder %s393_s10, %s520_s7 }
 0x2b6   :  { %p399_p7 = pnand %p397_p6, %p394_p5 }
 0x2b8   :  { %402 = shalt.err (!%p399_p7)
}
 0x2b9   :  { %311 = dma.vmem_to_hbm [thread:$0]  %s309_s29, 16, %s520_s7, [#allocation4]  }
 0x2ba   :  { %403 = dma.done.wait [#allocation4], 16  }
 0x2bb   :  { %404 = vsyncadd [#allocation4], 4294967280 }
 0x2bc   :  { %315 = vsyncpa [#allocation4], 1 }

</bundles_post_ra>
